<compile_context>
chip_gen: v7x
topology: tpu7x:2x2x1
jax: 0.10.0
libtpu: 0.0.40
codegen_flags: <defaults>
</compile_context>

<pallas_src>
import jax
import jax.numpy as jnp
from jax import lax
from jax.experimental import pallas as pl
from jax.experimental.pallas import tpu as pltpu


def make_synth_attention_kernel(n_head, head_size, bblk, seq_len, n_embd):
    H, hs, T, E = n_head, head_size, seq_len, n_embd
    M = bblk * T          # rows (batch*seq) handled per grid step
    G = H * bblk          # (head, batch) groups per grid step

    def kernel(x_ref, w1_ref, b1_ref, wv_ref, bv_ref, w2_ref, b2_ref,
               wp_ref, bp_ref, o_ref):
        # (Bblk, T, E) -> (M, E): merging batch into the sublane dim is a free view.
        xf = x_ref[...].reshape(M, E)

        # Per-head linears via per-head weight slabs: ref[h] is a leading-axis view,
        # so there is no lane-dim slicing anywhere.  Heads are stacked along sublanes.
        t1_parts, v_parts = [], []
        for h in range(H):                                   # static unroll, H small
            t1_parts.append(jnp.maximum(
                jnp.dot(xf, w1_ref[h], preferred_element_type=jnp.float32)
                + b1_ref[h], 0.0))                           # (M, hs), f32
            v_parts.append(
                jnp.dot(xf, wv_ref[h], preferred_element_type=jnp.float32)
                + bv_ref[h])                                 # (M, hs), f32
        t1s = jnp.concatenate(t1_parts, axis=0)              # (H*M, hs)
        vs = jnp.concatenate(v_parts, axis=0)                # (H*M, hs)

        # One batched synthesizer matmul for all heads & batch rows.
        att = (jnp.dot(t1s.astype(w2_ref.dtype), w2_ref[...],
                       preferred_element_type=jnp.float32)
               + b2_ref[...])                                # (H*M, T), f32
        att3 = att.reshape(G, T, T)                          # free split of sublane dim

        # Causal mask, built once and folded into the exponent (no -1e10 fill).
        qi = lax.broadcasted_iota(jnp.int32, (G, T, T), 1)
        ki = lax.broadcasted_iota(jnp.int32, (G, T, T), 2)
        causal = ki <= qi

        m = jnp.max(att3, axis=-1, keepdims=True)
        e = jnp.where(causal, jnp.exp(att3 - m), 0.0)
        p3 = e * pl.reciprocal(jnp.sum(e, axis=-1, keepdims=True), approx=True)
        # TODO(synk): attn_drop / resid_drop are identity (inference mode).

        # Per-(head, batch) att @ v as one batched einsum over G groups.
        v3 = vs.reshape(G, T, hs)
        y3 = jnp.einsum('gqk,gkd->gqd', p3, v3,
                        preferred_element_type=jnp.float32)  # (G, T, hs)
        yh = y3.reshape(H, M, hs)

        # Output projection: accumulate per-head contributions (no concat; the only
        # per-head access is a leading-axis index of the (H, hs, E) weight slab).
        acc = jnp.zeros((M, E), jnp.float32)
        for h in range(H):
            acc = acc + jnp.dot(yh[h].astype(wp_ref.dtype), wp_ref[h],
                                preferred_element_type=jnp.float32)
        o_ref[...] = (acc + bp_ref[...]).reshape(bblk, T, E).astype(o_ref.dtype)

    return kernel


def _choose_batch_block(B, T, target_rows=1024):
    """Largest divisor of B such that Bblk*T stays around `target_rows` rows."""
    bblk = max(1, min(B, max(1, target_rows // max(T, 1))))
    while B % bblk:
        bblk -= 1
    return bblk


def synthesizer_attention(x, params, n_head, *, matmul_dtype=None):
    """x: (B, T, E).  matmul_dtype: optional (e.g. jnp.bfloat16) for MXU operands only;
    bias / ReLU / mask / softmax math stays float32 inside the kernel."""
    B, T, E = x.shape
    assert E % n_head == 0
    H = n_head
    hs = E // H
    bblk = _choose_batch_block(B, T)

    f32 = jnp.float32
    wd = matmul_dtype or x.dtype

    # Per-head weight slabs (prepared outside the kernel; plain XLA reshapes).
    w1t = params["w1_w"].T.reshape(E, H, hs).transpose(1, 0, 2).astype(wd)   # (H, E, hs)
    b1 = params["w1_b"].reshape(H, 1, hs).astype(f32)
    wvt = params["v_w"].T.reshape(E, H, hs).transpose(1, 0, 2).astype(wd)    # (H, E, hs)
    bv = params["v_b"].reshape(H, 1, hs).astype(f32)
    wpt = params["p_w"].T.reshape(H, hs, E).astype(wd)                       # (H, hs, E)
    bp = params["p_b"].reshape(1, E).astype(f32)
    w2 = params["w2"][:, :T].astype(wd)                                      # (hs, T)
    b2 = params["b2"][:T].reshape(1, T).astype(f32)

    xk = x.astype(wd)

    kernel = make_synth_attention_kernel(H, hs, bblk, T, E)

    full = lambda shape: pl.BlockSpec(shape, lambda b: (0,) * len(shape))

    return pl.pallas_call(
        kernel,
        out_shape=jax.ShapeDtypeStruct((B, T, E), x.dtype),
        grid_spec=pltpu.PrefetchScalarGridSpec(
            num_scalar_prefetch=0,
            grid=(B // bblk,),
            in_specs=[
                pl.BlockSpec((bblk, T, E), lambda b: (b, 0, 0)),   # x, batch-blocked
                full((H, E, hs)),                                  # w1^T per-head slabs
                full((H, 1, hs)),                                  # b1 per head
                full((H, E, hs)),                                  # value w^T slabs
                full((H, 1, hs)),                                  # value b per head
                full((hs, T)),                                     # w2 (sliced to T)
                full((1, T)),                                      # b2 (sliced to T)
                full((H, hs, E)),                                  # proj w^T slabs
                full((1, E)),                                      # proj b
            ],
            out_specs=pl.BlockSpec((bblk, T, E), lambda b: (b, 0, 0)),
        ),
        compiler_params=pltpu.CompilerParams(
            dimension_semantics=("parallel",)),
    )(xk, w1t, b1, wvt, bv, w2, b2, wpt, bp)


def reference(x, params, n_head):
    """Plain-JAX re-implementation of the PyTorch forward (eval mode)."""
    B, T, E = x.shape
    hs = E // n_head
    t1 = jax.nn.relu(x @ params["w1_w"].T + params["w1_b"])
    t1 = t1.reshape(B, T, n_head, hs).transpose(0, 2, 1, 3)        # (B,H,T,hs)
    w2 = params["w2"][:, :T][None, None]                           # (1,1,hs,T)
    b2 = params["b2"][:T][None, None, None]                        # (1,1,1,T)
    att = t1 @ w2 + b2                                             # (B,H,T,T)
    mask = jnp.tril(jnp.ones((T, T)))[None, None]
    att = jnp.where(mask == 0, -1e10, att)
    att = jax.nn.softmax(att, axis=-1)
    v = (x @ params["v_w"].T + params["v_b"]).reshape(B, T, n_head, hs).transpose(0, 2, 1, 3)
    y = (att @ v).transpose(0, 2, 1, 3).reshape(B, T, E)
    return y @ params["p_w"].T + params["p_b"]


if __name__ == "__main__":
    # config: n_embd=32, n_head=4, block_size=9  (so block_size-1 = 8 = seq len)
    B, T, E, H = 2, 8, 32, 4
    block_size = T + 1
    hs = E // H

    key = jax.random.PRNGKey(0)
    ks = jax.random.split(key, 8)
    params = {
        "w1_w": jax.random.normal(ks[0], (E, E), jnp.float32) * 0.05,
        "w1_b": jax.random.normal(ks[1], (E,), jnp.float32) * 0.05,
        "w2":   jax.random.uniform(ks[2], (hs, block_size - 1), jnp.float32,
                                   minval=-0.001, maxval=0.001),
        "b2":   jnp.zeros((block_size - 1,), jnp.float32),
        "v_w":  jax.random.normal(ks[3], (E, E), jnp.float32) * 0.05,
        "v_b":  jax.random.normal(ks[4], (E,), jnp.float32) * 0.05,
        "p_w":  jax.random.normal(ks[5], (E, E), jnp.float32) * 0.05,
        "p_b":  jax.random.normal(ks[6], (E,), jnp.float32) * 0.05,
    }
    x = jax.random.normal(ks[7], (B, T, E), jnp.float32)

    y = synthesizer_attention(x, params, H)
    y = jax.block_until_ready(y)

    y_ref = reference(x, params, H)
    assert y.shape == (B, T, E)
    # tolerance accounts for the approximate (EUP) reciprocal in the softmax normalization
    assert jnp.allclose(y, y_ref, atol=2e-3, rtol=2e-3), "mismatch vs reference"
    print("KERNEL_OK")
</pallas_src>

<mosaic_0001>
module attributes {stable_mosaic.version = 11 : i64} {
  func.func @kernel(%arg0: i32, %arg1: memref<2x8x32xf32, #tpu.memory_space<vmem>>, %arg2: memref<4x32x8xf32, #tpu.memory_space<vmem>>, %arg3: memref<4x1x8xf32, #tpu.memory_space<vmem>>, %arg4: memref<4x32x8xf32, #tpu.memory_space<vmem>>, %arg5: memref<4x1x8xf32, #tpu.memory_space<vmem>>, %arg6: memref<8x8xf32, #tpu.memory_space<vmem>>, %arg7: memref<1x8xf32, #tpu.memory_space<vmem>>, %arg8: memref<4x8x32xf32, #tpu.memory_space<vmem>>, %arg9: memref<1x32xf32, #tpu.memory_space<vmem>>, %arg10: memref<2x8x32xf32, #tpu.memory_space<vmem>>) attributes {dimension_semantics = [#tpu.dimension_semantics<parallel>], iteration_bounds = array<i64: 1>, scalar_prefetch = 0 : i64, scratch_operands = 0 : i64, tpu.core_type = #tpu.core_type<tc>, window_params = [{transform_indices = @transform_0, window_bounds = array<i64: 2, 8, 32>}, {pipeline_mode = #tpu.pipeline_mode<synchronous>, transform_indices = @transform_1, window_bounds = array<i64: 4, 32, 8>}, {pipeline_mode = #tpu.pipeline_mode<synchronous>, transform_indices = @transform_2, window_bounds = array<i64: 4, 1, 8>}, {pipeline_mode = #tpu.pipeline_mode<synchronous>, transform_indices = @transform_3, window_bounds = array<i64: 4, 32, 8>}, {pipeline_mode = #tpu.pipeline_mode<synchronous>, transform_indices = @transform_4, window_bounds = array<i64: 4, 1, 8>}, {pipeline_mode = #tpu.pipeline_mode<synchronous>, transform_indices = @transform_5, window_bounds = array<i64: 8, 8>}, {pipeline_mode = #tpu.pipeline_mode<synchronous>, transform_indices = @transform_6, window_bounds = array<i64: 1, 8>}, {pipeline_mode = #tpu.pipeline_mode<synchronous>, transform_indices = @transform_7, window_bounds = array<i64: 4, 8, 32>}, {pipeline_mode = #tpu.pipeline_mode<synchronous>, transform_indices = @transform_8, window_bounds = array<i64: 1, 32>}, {transform_indices = @transform_9, window_bounds = array<i64: 2, 8, 32>}]} {
    %c0 = arith.constant 0 : index
    %c0_0 = arith.constant 0 : index
    %c0_1 = arith.constant 0 : index
    %0 = vector.load %arg1[%c0, %c0_0, %c0_1] : memref<2x8x32xf32, #tpu.memory_space<vmem>>, vector<2x8x32xf32>
    %1 = vector.shape_cast %0 : vector<2x8x32xf32> to vector<16x32xf32>
    %c0_2 = arith.constant 0 : index
    %c0_3 = arith.constant 0 : index
    %c0_4 = arith.constant 0 : index
    %2 = vector.load %arg2[%c0_2, %c0_3, %c0_4] : memref<4x32x8xf32, #tpu.memory_space<vmem>>, vector<1x32x8xf32>
    %3 = vector.shape_cast %2 : vector<1x32x8xf32> to vector<32x8xf32>
    %cst = arith.constant dense<0.000000e+00> : vector<16x8xf32>
    %4 = tpu.matmul %1, %3, %cst {dimension_numbers = #tpu.dot_dimension_numbers<[1], [0], [0], [1], [0, 0, 1, 1], [], []>} : vector<16x32xf32>, vector<32x8xf32>, vector<16x8xf32> -> vector<16x8xf32>
    %c0_5 = arith.constant 0 : index
    %c0_6 = arith.constant 0 : index
    %c0_7 = arith.constant 0 : index
    %5 = vector.load %arg3[%c0_5, %c0_6, %c0_7] : memref<4x1x8xf32, #tpu.memory_space<vmem>>, vector<1x1x8xf32>
    %6 = vector.shape_cast %5 : vector<1x1x8xf32> to vector<1x8xf32>
    %7 = vector.broadcast %6 : vector<1x8xf32> to vector<16x8xf32>
    %8 = arith.addf %4, %7 : vector<16x8xf32>
    %cst_8 = arith.constant 0.000000e+00 : f32
    %9 = vector.broadcast %cst_8 : f32 to vector<16x8xf32>
    %10 = arith.maximumf %8, %9 : vector<16x8xf32>
    %c0_9 = arith.constant 0 : index
    %c0_10 = arith.constant 0 : index
    %c0_11 = arith.constant 0 : index
    %11 = vector.load %arg4[%c0_9, %c0_10, %c0_11] : memref<4x32x8xf32, #tpu.memory_space<vmem>>, vector<1x32x8xf32>
    %12 = vector.shape_cast %11 : vector<1x32x8xf32> to vector<32x8xf32>
    %cst_12 = arith.constant dense<0.000000e+00> : vector<16x8xf32>
    %13 = tpu.matmul %1, %12, %cst_12 {dimension_numbers = #tpu.dot_dimension_numbers<[1], [0], [0], [1], [0, 0, 1, 1], [], []>} : vector<16x32xf32>, vector<32x8xf32>, vector<16x8xf32> -> vector<16x8xf32>
    %c0_13 = arith.constant 0 : index
    %c0_14 = arith.constant 0 : index
    %c0_15 = arith.constant 0 : index
    %14 = vector.load %arg5[%c0_13, %c0_14, %c0_15] : memref<4x1x8xf32, #tpu.memory_space<vmem>>, vector<1x1x8xf32>
    %15 = vector.shape_cast %14 : vector<1x1x8xf32> to vector<1x8xf32>
    %16 = vector.broadcast %15 : vector<1x8xf32> to vector<16x8xf32>
    %17 = arith.addf %13, %16 : vector<16x8xf32>
    %c1 = arith.constant 1 : index
    %c0_16 = arith.constant 0 : index
    %c0_17 = arith.constant 0 : index
    %18 = vector.load %arg2[%c1, %c0_16, %c0_17] : memref<4x32x8xf32, #tpu.memory_space<vmem>>, vector<1x32x8xf32>
    %19 = vector.shape_cast %18 : vector<1x32x8xf32> to vector<32x8xf32>
    %cst_18 = arith.constant dense<0.000000e+00> : vector<16x8xf32>
    %20 = tpu.matmul %1, %19, %cst_18 {dimension_numbers = #tpu.dot_dimension_numbers<[1], [0], [0], [1], [0, 0, 1, 1], [], []>} : vector<16x32xf32>, vector<32x8xf32>, vector<16x8xf32> -> vector<16x8xf32>
    %c1_19 = arith.constant 1 : index
    %c0_20 = arith.constant 0 : index
    %c0_21 = arith.constant 0 : index
    %21 = vector.load %arg3[%c1_19, %c0_20, %c0_21] : memref<4x1x8xf32, #tpu.memory_space<vmem>>, vector<1x1x8xf32>
    %22 = vector.shape_cast %21 : vector<1x1x8xf32> to vector<1x8xf32>
    %23 = vector.broadcast %22 : vector<1x8xf32> to vector<16x8xf32>
    %24 = arith.addf %20, %23 : vector<16x8xf32>
    %cst_22 = arith.constant 0.000000e+00 : f32
    %25 = vector.broadcast %cst_22 : f32 to vector<16x8xf32>
    %26 = arith.maximumf %24, %25 : vector<16x8xf32>
    %c1_23 = arith.constant 1 : index
    %c0_24 = arith.constant 0 : index
    %c0_25 = arith.constant 0 : index
    %27 = vector.load %arg4[%c1_23, %c0_24, %c0_25] : memref<4x32x8xf32, #tpu.memory_space<vmem>>, vector<1x32x8xf32>
    %28 = vector.shape_cast %27 : vector<1x32x8xf32> to vector<32x8xf32>
    %cst_26 = arith.constant dense<0.000000e+00> : vector<16x8xf32>
    %29 = tpu.matmul %1, %28, %cst_26 {dimension_numbers = #tpu.dot_dimension_numbers<[1], [0], [0], [1], [0, 0, 1, 1], [], []>} : vector<16x32xf32>, vector<32x8xf32>, vector<16x8xf32> -> vector<16x8xf32>
    %c1_27 = arith.constant 1 : index
    %c0_28 = arith.constant 0 : index
    %c0_29 = arith.constant 0 : index
    %30 = vector.load %arg5[%c1_27, %c0_28, %c0_29] : memref<4x1x8xf32, #tpu.memory_space<vmem>>, vector<1x1x8xf32>
    %31 = vector.shape_cast %30 : vector<1x1x8xf32> to vector<1x8xf32>
    %32 = vector.broadcast %31 : vector<1x8xf32> to vector<16x8xf32>
    %33 = arith.addf %29, %32 : vector<16x8xf32>
    %c2 = arith.constant 2 : index
    %c0_30 = arith.constant 0 : index
    %c0_31 = arith.constant 0 : index
    %34 = vector.load %arg2[%c2, %c0_30, %c0_31] : memref<4x32x8xf32, #tpu.memory_space<vmem>>, vector<1x32x8xf32>
    %35 = vector.shape_cast %34 : vector<1x32x8xf32> to vector<32x8xf32>
    %cst_32 = arith.constant dense<0.000000e+00> : vector<16x8xf32>
    %36 = tpu.matmul %1, %35, %cst_32 {dimension_numbers = #tpu.dot_dimension_numbers<[1], [0], [0], [1], [0, 0, 1, 1], [], []>} : vector<16x32xf32>, vector<32x8xf32>, vector<16x8xf32> -> vector<16x8xf32>
    %c2_33 = arith.constant 2 : index
    %c0_34 = arith.constant 0 : index
    %c0_35 = arith.constant 0 : index
    %37 = vector.load %arg3[%c2_33, %c0_34, %c0_35] : memref<4x1x8xf32, #tpu.memory_space<vmem>>, vector<1x1x8xf32>
    %38 = vector.shape_cast %37 : vector<1x1x8xf32> to vector<1x8xf32>
    %39 = vector.broadcast %38 : vector<1x8xf32> to vector<16x8xf32>
    %40 = arith.addf %36, %39 : vector<16x8xf32>
    %cst_36 = arith.constant 0.000000e+00 : f32
    %41 = vector.broadcast %cst_36 : f32 to vector<16x8xf32>
    %42 = arith.maximumf %40, %41 : vector<16x8xf32>
    %c2_37 = arith.constant 2 : index
    %c0_38 = arith.constant 0 : index
    %c0_39 = arith.constant 0 : index
    %43 = vector.load %arg4[%c2_37, %c0_38, %c0_39] : memref<4x32x8xf32, #tpu.memory_space<vmem>>, vector<1x32x8xf32>
    %44 = vector.shape_cast %43 : vector<1x32x8xf32> to vector<32x8xf32>
    %cst_40 = arith.constant dense<0.000000e+00> : vector<16x8xf32>
    %45 = tpu.matmul %1, %44, %cst_40 {dimension_numbers = #tpu.dot_dimension_numbers<[1], [0], [0], [1], [0, 0, 1, 1], [], []>} : vector<16x32xf32>, vector<32x8xf32>, vector<16x8xf32> -> vector<16x8xf32>
    %c2_41 = arith.constant 2 : index
    %c0_42 = arith.constant 0 : index
    %c0_43 = arith.constant 0 : index
    %46 = vector.load %arg5[%c2_41, %c0_42, %c0_43] : memref<4x1x8xf32, #tpu.memory_space<vmem>>, vector<1x1x8xf32>
    %47 = vector.shape_cast %46 : vector<1x1x8xf32> to vector<1x8xf32>
    %48 = vector.broadcast %47 : vector<1x8xf32> to vector<16x8xf32>
    %49 = arith.addf %45, %48 : vector<16x8xf32>
    %c3 = arith.constant 3 : index
    %c0_44 = arith.constant 0 : index
    %c0_45 = arith.constant 0 : index
    %50 = vector.load %arg2[%c3, %c0_44, %c0_45] : memref<4x32x8xf32, #tpu.memory_space<vmem>>, vector<1x32x8xf32>
    %51 = vector.shape_cast %50 : vector<1x32x8xf32> to vector<32x8xf32>
    %cst_46 = arith.constant dense<0.000000e+00> : vector<16x8xf32>
    %52 = tpu.matmul %1, %51, %cst_46 {dimension_numbers = #tpu.dot_dimension_numbers<[1], [0], [0], [1], [0, 0, 1, 1], [], []>} : vector<16x32xf32>, vector<32x8xf32>, vector<16x8xf32> -> vector<16x8xf32>
    %c3_47 = arith.constant 3 : index
    %c0_48 = arith.constant 0 : index
    %c0_49 = arith.constant 0 : index
    %53 = vector.load %arg3[%c3_47, %c0_48, %c0_49] : memref<4x1x8xf32, #tpu.memory_space<vmem>>, vector<1x1x8xf32>
    %54 = vector.shape_cast %53 : vector<1x1x8xf32> to vector<1x8xf32>
    %55 = vector.broadcast %54 : vector<1x8xf32> to vector<16x8xf32>
    %56 = arith.addf %52, %55 : vector<16x8xf32>
    %cst_50 = arith.constant 0.000000e+00 : f32
    %57 = vector.broadcast %cst_50 : f32 to vector<16x8xf32>
    %58 = arith.maximumf %56, %57 : vector<16x8xf32>
    %c3_51 = arith.constant 3 : index
    %c0_52 = arith.constant 0 : index
    %c0_53 = arith.constant 0 : index
    %59 = vector.load %arg4[%c3_51, %c0_52, %c0_53] : memref<4x32x8xf32, #tpu.memory_space<vmem>>, vector<1x32x8xf32>
    %60 = vector.shape_cast %59 : vector<1x32x8xf32> to vector<32x8xf32>
    %cst_54 = arith.constant dense<0.000000e+00> : vector<16x8xf32>
    %61 = tpu.matmul %1, %60, %cst_54 {dimension_numbers = #tpu.dot_dimension_numbers<[1], [0], [0], [1], [0, 0, 1, 1], [], []>} : vector<16x32xf32>, vector<32x8xf32>, vector<16x8xf32> -> vector<16x8xf32>
    %c3_55 = arith.constant 3 : index
    %c0_56 = arith.constant 0 : index
    %c0_57 = arith.constant 0 : index
    %62 = vector.load %arg5[%c3_55, %c0_56, %c0_57] : memref<4x1x8xf32, #tpu.memory_space<vmem>>, vector<1x1x8xf32>
    %63 = vector.shape_cast %62 : vector<1x1x8xf32> to vector<1x8xf32>
    %64 = vector.broadcast %63 : vector<1x8xf32> to vector<16x8xf32>
    %65 = arith.addf %61, %64 : vector<16x8xf32>
    %66 = tpu.concatenate %10, %26, %42, %58 in 0 : vector<16x8xf32>, vector<16x8xf32>, vector<16x8xf32>, vector<16x8xf32> -> vector<64x8xf32>
    %67 = tpu.concatenate %17, %33, %49, %65 in 0 : vector<16x8xf32>, vector<16x8xf32>, vector<16x8xf32>, vector<16x8xf32> -> vector<64x8xf32>
    %c0_58 = arith.constant 0 : index
    %c0_59 = arith.constant 0 : index
    %68 = vector.load %arg6[%c0_58, %c0_59] : memref<8x8xf32, #tpu.memory_space<vmem>>, vector<8x8xf32>
    %cst_60 = arith.constant dense<0.000000e+00> : vector<64x8xf32>
    %69 = tpu.matmul %66, %68, %cst_60 {dimension_numbers = #tpu.dot_dimension_numbers<[1], [0], [0], [1], [0, 0, 1, 1], [], []>} : vector<64x8xf32>, vector<8x8xf32>, vector<64x8xf32> -> vector<64x8xf32>
    %c0_61 = arith.constant 0 : index
    %c0_62 = arith.constant 0 : index
    %70 = vector.load %arg7[%c0_61, %c0_62] : memref<1x8xf32, #tpu.memory_space<vmem>>, vector<1x8xf32>
    %71 = vector.broadcast %70 : vector<1x8xf32> to vector<64x8xf32>
    %72 = arith.addf %69, %71 : vector<64x8xf32>
    %73 = vector.shape_cast %72 : vector<64x8xf32> to vector<8x8x8xf32>
    %74 = tpu.iota {dimensions = array<i32: 1>} : vector<8x8x8xi32>
    %75 = tpu.iota {dimensions = array<i32: 2>} : vector<8x8x8xi32>
    %76 = arith.cmpi sle, %75, %74 : vector<8x8x8xi32>
    %cst_63 = arith.constant dense<0xFF800000> : vector<8x8xf32>
    %77 = vector.multi_reduction <maximumf>, %73, %cst_63 [2] : vector<8x8x8xf32> to vector<8x8xf32>
    %78 = vector.shape_cast %77 : vector<8x8xf32> to vector<8x8x1xf32>
    %79 = vector.broadcast %78 : vector<8x8x1xf32> to vector<8x8x8xf32>
    %80 = arith.subf %73, %79 : vector<8x8x8xf32>
    %81 = math.exp %80 : vector<8x8x8xf32>
    %cst_64 = arith.constant 0.000000e+00 : f32
    %82 = vector.broadcast %cst_64 : f32 to vector<8x8x8xf32>
    %83 = arith.select %76, %81, %82 : vector<8x8x8xi1>, vector<8x8x8xf32>
    %cst_65 = arith.constant dense<0.000000e+00> : vector<8x8xf32>
    %84 = vector.multi_reduction <add>, %83, %cst_65 [2] : vector<8x8x8xf32> to vector<8x8xf32>
    %85 = vector.shape_cast %84 : vector<8x8xf32> to vector<8x8x1xf32>
    %86 = tpu.reciprocal %85 {approx = true} : vector<8x8x1xf32> -> vector<8x8x1xf32>
    %87 = vector.broadcast %86 : vector<8x8x1xf32> to vector<8x8x8xf32>
    %88 = arith.mulf %83, %87 : vector<8x8x8xf32>
    %89 = vector.shape_cast %67 : vector<64x8xf32> to vector<8x8x8xf32>
    "tpu.trace_start"() <{level = 10 : i32, message = "gqk,gkd->gqd"}> : () -> ()
    %cst_66 = arith.constant dense<0.000000e+00> : vector<8x8x8xf32>
    %90 = tpu.matmul %88, %89, %cst_66 {dimension_numbers = #tpu.dot_dimension_numbers<[2], [1], [1], [2], [0, 0, 0, 1, 1, 2], [0], [0]>} : vector<8x8x8xf32>, vector<8x8x8xf32>, vector<8x8x8xf32> -> vector<8x8x8xf32>
    "tpu.trace_stop"() : () -> ()
    %91 = vector.shape_cast %90 : vector<8x8x8xf32> to vector<4x16x8xf32>
    %cst_67 = arith.constant 0.000000e+00 : f32
    %92 = vector.broadcast %cst_67 : f32 to vector<16x32xf32>
    %93 = vector.extract_strided_slice %91 {offsets = [0, 0, 0], sizes = [1, 16, 8], strides = [1, 1, 1]} : vector<4x16x8xf32> to vector<1x16x8xf32>
    %94 = vector.shape_cast %93 : vector<1x16x8xf32> to vector<16x8xf32>
    %c0_68 = arith.constant 0 : index
    %c0_69 = arith.constant 0 : index
    %c0_70 = arith.constant 0 : index
    %95 = vector.load %arg8[%c0_68, %c0_69, %c0_70] : memref<4x8x32xf32, #tpu.memory_space<vmem>>, vector<1x8x32xf32>
    %96 = vector.shape_cast %95 : vector<1x8x32xf32> to vector<8x32xf32>
    %cst_71 = arith.constant dense<0.000000e+00> : vector<16x32xf32>
    %97 = tpu.matmul %94, %96, %cst_71 {dimension_numbers = #tpu.dot_dimension_numbers<[1], [0], [0], [1], [0, 0, 1, 1], [], []>} : vector<16x8xf32>, vector<8x32xf32>, vector<16x32xf32> -> vector<16x32xf32>
    %98 = arith.addf %92, %97 : vector<16x32xf32>
    %99 = vector.extract_strided_slice %91 {offsets = [1, 0, 0], sizes = [1, 16, 8], strides = [1, 1, 1]} : vector<4x16x8xf32> to vector<1x16x8xf32>
    %100 = vector.shape_cast %99 : vector<1x16x8xf32> to vector<16x8xf32>
    %c1_72 = arith.constant 1 : index
    %c0_73 = arith.constant 0 : index
    %c0_74 = arith.constant 0 : index
    %101 = vector.load %arg8[%c1_72, %c0_73, %c0_74] : memref<4x8x32xf32, #tpu.memory_space<vmem>>, vector<1x8x32xf32>
    %102 = vector.shape_cast %101 : vector<1x8x32xf32> to vector<8x32xf32>
    %cst_75 = arith.constant dense<0.000000e+00> : vector<16x32xf32>
    %103 = tpu.matmul %100, %102, %cst_75 {dimension_numbers = #tpu.dot_dimension_numbers<[1], [0], [0], [1], [0, 0, 1, 1], [], []>} : vector<16x8xf32>, vector<8x32xf32>, vector<16x32xf32> -> vector<16x32xf32>
    %104 = arith.addf %98, %103 : vector<16x32xf32>
    %105 = vector.extract_strided_slice %91 {offsets = [2, 0, 0], sizes = [1, 16, 8], strides = [1, 1, 1]} : vector<4x16x8xf32> to vector<1x16x8xf32>
    %106 = vector.shape_cast %105 : vector<1x16x8xf32> to vector<16x8xf32>
    %c2_76 = arith.constant 2 : index
    %c0_77 = arith.constant 0 : index
    %c0_78 = arith.constant 0 : index
    %107 = vector.load %arg8[%c2_76, %c0_77, %c0_78] : memref<4x8x32xf32, #tpu.memory_space<vmem>>, vector<1x8x32xf32>
    %108 = vector.shape_cast %107 : vector<1x8x32xf32> to vector<8x32xf32>
    %cst_79 = arith.constant dense<0.000000e+00> : vector<16x32xf32>
    %109 = tpu.matmul %106, %108, %cst_79 {dimension_numbers = #tpu.dot_dimension_numbers<[1], [0], [0], [1], [0, 0, 1, 1], [], []>} : vector<16x8xf32>, vector<8x32xf32>, vector<16x32xf32> -> vector<16x32xf32>
    %110 = arith.addf %104, %109 : vector<16x32xf32>
    %111 = vector.extract_strided_slice %91 {offsets = [3, 0, 0], sizes = [1, 16, 8], strides = [1, 1, 1]} : vector<4x16x8xf32> to vector<1x16x8xf32>
    %112 = vector.shape_cast %111 : vector<1x16x8xf32> to vector<16x8xf32>
    %c3_80 = arith.constant 3 : index
    %c0_81 = arith.constant 0 : index
    %c0_82 = arith.constant 0 : index
    %113 = vector.load %arg8[%c3_80, %c0_81, %c0_82] : memref<4x8x32xf32, #tpu.memory_space<vmem>>, vector<1x8x32xf32>
    %114 = vector.shape_cast %113 : vector<1x8x32xf32> to vector<8x32xf32>
    %cst_83 = arith.constant dense<0.000000e+00> : vector<16x32xf32>
    %115 = tpu.matmul %112, %114, %cst_83 {dimension_numbers = #tpu.dot_dimension_numbers<[1], [0], [0], [1], [0, 0, 1, 1], [], []>} : vector<16x8xf32>, vector<8x32xf32>, vector<16x32xf32> -> vector<16x32xf32>
    %116 = arith.addf %110, %115 : vector<16x32xf32>
    %c0_84 = arith.constant 0 : index
    %c0_85 = arith.constant 0 : index
    %117 = vector.load %arg9[%c0_84, %c0_85] : memref<1x32xf32, #tpu.memory_space<vmem>>, vector<1x32xf32>
    %118 = vector.broadcast %117 : vector<1x32xf32> to vector<16x32xf32>
    %119 = arith.addf %116, %118 : vector<16x32xf32>
    %120 = vector.shape_cast %119 : vector<16x32xf32> to vector<2x8x32xf32>
    %c0_86 = arith.constant 0 : index
    %c0_87 = arith.constant 0 : index
    %c0_88 = arith.constant 0 : index
    %121 = vector.load %arg10[%c0_86, %c0_87, %c0_88] : memref<2x8x32xf32, #tpu.memory_space<vmem>>, vector<2x8x32xf32>
    tpu.vector_store %arg10[%c0_86, %c0_87, %c0_88], %120 {strides = array<i32>} : memref<2x8x32xf32, #tpu.memory_space<vmem>>, vector<2x8x32xf32>,
    return
  }
  func.func @transform_0(%arg0: i32) -> (i32, i32, i32) {
    %c0_i32 = arith.constant 0 : i32
    %c0_i32_0 = arith.constant 0 : i32
    %c0_i32_1 = arith.constant 0 : i32
    return %arg0, %c0_i32, %c0_i32_0 : i32, i32, i32
  }
  func.func @transform_1(%arg0: i32) -> (i32, i32, i32) {
    %c0_i32 = arith.constant 0 : i32
    %c0_i32_0 = arith.constant 0 : i32
    %c0_i32_1 = arith.constant 0 : i32
    %c0_i32_2 = arith.constant 0 : i32
    return %c0_i32, %c0_i32_0, %c0_i32_1 : i32, i32, i32
  }
  func.func @transform_2(%arg0: i32) -> (i32, i32, i32) {
    %c0_i32 = arith.constant 0 : i32
    %c0_i32_0 = arith.constant 0 : i32
    %c0_i32_1 = arith.constant 0 : i32
    %c0_i32_2 = arith.constant 0 : i32
    return %c0_i32, %c0_i32_0, %c0_i32_1 : i32, i32, i32
  }
  func.func @transform_3(%arg0: i32) -> (i32, i32, i32) {
    %c0_i32 = arith.constant 0 : i32
    %c0_i32_0 = arith.constant 0 : i32
    %c0_i32_1 = arith.constant 0 : i32
    %c0_i32_2 = arith.constant 0 : i32
    return %c0_i32, %c0_i32_0, %c0_i32_1 : i32, i32, i32
  }
  func.func @transform_4(%arg0: i32) -> (i32, i32, i32) {
    %c0_i32 = arith.constant 0 : i32
    %c0_i32_0 = arith.constant 0 : i32
    %c0_i32_1 = arith.constant 0 : i32
    %c0_i32_2 = arith.constant 0 : i32
    return %c0_i32, %c0_i32_0, %c0_i32_1 : i32, i32, i32
  }
  func.func @transform_5(%arg0: i32) -> (i32, i32) {
    %c0_i32 = arith.constant 0 : i32
    %c0_i32_0 = arith.constant 0 : i32
    %c0_i32_1 = arith.constant 0 : i32
    return %c0_i32, %c0_i32_0 : i32, i32
  }
  func.func @transform_6(%arg0: i32) -> (i32, i32) {
    %c0_i32 = arith.constant 0 : i32
    %c0_i32_0 = arith.constant 0 : i32
    %c0_i32_1 = arith.constant 0 : i32
    return %c0_i32, %c0_i32_0 : i32, i32
  }
  func.func @transform_7(%arg0: i32) -> (i32, i32, i32) {
    %c0_i32 = arith.constant 0 : i32
    %c0_i32_0 = arith.constant 0 : i32
    %c0_i32_1 = arith.constant 0 : i32
    %c0_i32_2 = arith.constant 0 : i32
    return %c0_i32, %c0_i32_0, %c0_i32_1 : i32, i32, i32
  }
  func.func @transform_8(%arg0: i32) -> (i32, i32) {
    %c0_i32 = arith.constant 0 : i32
    %c0_i32_0 = arith.constant 0 : i32
    %c0_i32_1 = arith.constant 0 : i32
    return %c0_i32, %c0_i32_0 : i32, i32
  }
  func.func @transform_9(%arg0: i32) -> (i32, i32, i32) {
    %c0_i32 = arith.constant 0 : i32
    %c0_i32_0 = arith.constant 0 : i32
    %c0_i32_1 = arith.constant 0 : i32
    return %arg0, %c0_i32, %c0_i32_0 : i32, i32, i32
  }
}

</mosaic_0001>

<bundles_post_ra>
// kernel: tpu_custom_call.1
= control target key start
LH: loop header
LB: loop body
LE: loop exit
PB: predicated region body
PF: predicated region fallthrough
CT: control target
= control target key end

     0   :  { %vm46_vm0 = vcmask 261120   ;;  %s2764_s0 = inlined_call_operand.vmem [shape: f32[2,8,32], index: 0, kind: input, shape index: {}]   ;;  %s2765_s1 = inlined_call_operand.vmem [shape: f32[4,32,8], index: 1, kind: input, shape index: {}]   ;;  %s2766_s2 = inlined_call_operand.vmem [shape: f32[4,1,8], index: 2, kind: input, shape index: {}]   ;;  %s2767_s3 = inlined_call_operand.vmem [shape: f32[4,32,8], index: 3, kind: input, shape index: {}]   ;;  %s2768_s4 = inlined_call_operand.vmem [shape: f32[4,1,8], index: 4, kind: input, shape index: {}]   ;;  %s2769_s5 = inlined_call_operand.vmem [shape: f32[8,8], index: 5, kind: input, shape index: {}]   ;;  %s2770_s6 = inlined_call_operand.vmem [shape: f32[1,8], index: 6, kind: input, shape index: {}]   ;;  %s2771_s7 = inlined_call_operand.vmem [shape: f32[4,8,32], index: 7, kind: input, shape index: {}]   ;;  %s2772_s8 = inlined_call_operand.vmem [shape: f32[1,32], index: 8, kind: input, shape index: {}]   ;;  %s2773_s9 = inlined_call_operand.hbm [shape: f32[2,8,32], index: 9, kind: output, shape index: {}]  }
   0x1   :  { %v35_v0 = vld [vmem:[%s2765_s1] sm:$0xff]  ;;  %v36_v1 = vld [vmem:[%s2765_s1 + $0x8] sm:$0xff]  ;;  %v37_v5 = vld [vmem:[%s2765_s1 + $0x10] sm:$0xff] }
   0x2   :  { %v1941_v2 = vld [vmem:[%s2765_s1 + $0x20] sm:$0xff]  ;;  %v2265_v3 = vpack.c.bf16 %v36_v1, %v35_v0  ;;  %v1942_v4 = vld [vmem:[%s2765_s1 + $0x28] sm:$0xff]  ;;  %v38_v6 = vld [vmem:[%s2765_s1 + $0x18] sm:$0xff] }
   0x3   :  { %v2281_v7 = vpack.c.bf16 %v1942_v4, %v1941_v2  ;;  %v2269_v8 = vpack.c.bf16 %v38_v6, %v37_v5  ;;  %v1943_v9 = vld [vmem:[%s2765_s1 + $0x30] sm:$0xff]  ;;  %v1944_v10 = vld [vmem:[%s2765_s1 + $0x38] sm:$0xff]  ;;  %v2478_v11 = vld [vmem:[%s2764_s0] sm:$0xff] }
   0x4   :  { %2266 = vmatprep.subr.bf16.mxu1 %v2265_v3  ;;  %v2285_v12 = vpack.c.bf16 %v1944_v10, %v1943_v9  ;;  %2111 = vmatprep.mubr.msk.f32.mxu1 %vm46_vm0, %v2478_v11  ;;  %v1957_v13 = vld [vmem:[%s2765_s1 + $0x40] sm:$0xff]  ;;  %v1958_v14 = vld [vmem:[%s2765_s1 + $0x48] sm:$0xff] }
   0x5   :  { %2282 = vmatprep.subr.bf16.mxu0 %v2281_v7  ;;  %2268 = vmatpush3.bf16.msra.mxu1 %v2265_v3  ;;  %v2297_v15 = vpack.c.bf16 %v1958_v14, %v1957_v13 }
   0x6   :  { %2284 = vmatpush3.bf16.msra.mxu0 %v2281_v7  ;;  %2270 = vmatprep.subr.bf16.mxu1 %v2269_v8 }
   0x7   :  { %2286 = vmatprep.subr.bf16.mxu0 %v2285_v12  ;;  %2133 = vmatprep.mubr.msk.f32.mxu0 %vm46_vm0, %v2478_v11 }
   0x8   :  { %14 = vsyncpa [#allocation3], 0  ;;  %v1959_v16 = vld [vmem:[%s2765_s1 + $0x50] sm:$0xff]  ;;  %v1960_v17 = vld [vmem:[%s2765_s1 + $0x58] sm:$0xff]  ;;  %vm758_vm1 = vcmask 64512   ;;  %vm2397_vm3 = vmmov 0  }
   0x9   :  { %2272 = vmatpush3.bf16.msra.mxu1 %v2269_v8  ;;  %v2499_v18 = vld [vmem:[%s2764_s0 + $0x8] sm:$0xff]  ;;  %v2301_v19 = vpack.c.bf16 %v1960_v17, %v1959_v16  ;;  %v1973_v20 = vld [vmem:[%s2765_s1 + $0x60] sm:$0xff]  ;;  %v1975_v23 = vld [vmem:[%s2765_s1 + $0x70] sm:$0xff]  ;;  %s2398_s30 = smov [#allocation2]  }
   0xa   :  { %2288 = vmatpush3.bf16.msra.mxu0 %v2285_v12  ;;  %v1974_v21 = vld [vmem:[%s2765_s1 + $0x68] sm:$0xff]  ;;  %v1976_v24 = vld [vmem:[%s2765_s1 + $0x78] sm:$0xff]  ;;  %v750_v26 = vld [vmem:[%s2769_s5] sm:$0xff] }
   0xb   :  { %2298 = vmatprep.subr.bf16.mxu0 %v2297_v15  ;;  %v2313_v22 = vpack.c.bf16 %v1974_v21, %v1973_v20  ;;  %v2317_v25 = vpack.c.bf16 %v1976_v24, %v1975_v23  ;;  %v1935_v27 = vld [vmem:[%s2766_s2] ss:$0 sm:$0xff]  ;;  %v1946_v29 = vld [vmem:[%s2766_s2 + $0x1] ss:$0 sm:$0xff]  ;;  %v1962_v41 = vld [vmem:[%s2766_s2 + $0x2] ss:$0 sm:$0xff] }
   0xc   :  { %2112 = vmatmul.mubr.msk.f32.vlgmr.msra.gmra.mrb[0].mxu1 %vm46_vm0, %v2499_v18  ;;  %v1978_v48 = vld [vmem:[%s2766_s2 + $0x3] ss:$0 sm:$0xff]  ;;  %v131_v56 = vld [vmem:[%s2767_s3 + $0x8] sm:$0xff]  ;;  %v132_v57 = vld [vmem:[%s2767_s3 + $0x10] sm:$0xff] }
   0xd   :  { %2134 = vmatmul.mubr.msk.f32.vlgmr.msra.gmra.mrb[0].mxu0 %vm46_vm0, %v2499_v18  ;;  %2122 = vmatprep.mubr.msk.f32.mxu1 %vm46_vm0, %v2478_v11  ;;  %v130_v55 = vld [vmem:[%s2767_s3] sm:$0xff]  ;;  %v133_v59 = vld [vmem:[%s2767_s3 + $0x18] sm:$0xff]  ;;  %v1950_v62 = vld [vmem:[%s2767_s3 + $0x28] sm:$0xff] }
   0xe   :  { %2300 = vmatpush3.bf16.msra.mxu0 %v2297_v15  ;;  %2155 = vmatprep.mubr.msk.f32.mxu0 %vm46_vm0, %v2478_v11  ;;  %v2273_v58 = vpack.c.bf16 %v131_v56, %v130_v55  ;;  %v2277_v60 = vpack.c.bf16 %v133_v59, %v132_v57  ;;  %v1949_v61 = vld [vmem:[%s2767_s3 + $0x20] sm:$0xff]  ;;  %v1951_v0 = vld [vmem:[%s2767_s3 + $0x30] sm:$0xff]  ;;  %v1952_v1 = vld [vmem:[%s2767_s3 + $0x38] sm:$0xff] }
   0xf   :  { %2302 = vmatprep.subr.bf16.mxu0 %v2301_v19  ;;  %v2289_v63 = vpack.c.bf16 %v1950_v62, %v1949_v61  ;;  %v2293_v2 = vpack.c.bf16 %v1952_v1, %v1951_v0  ;;  %v1965_v3 = vld [vmem:[%s2767_s3 + $0x40] sm:$0xff]  ;;  %v1966_v4 = vld [vmem:[%s2767_s3 + $0x48] sm:$0xff]  ;;  %v1967_v6 = vld [vmem:[%s2767_s3 + $0x50] sm:$0xff] }
  0x10   :  { %2274 = vmatprep.subr.bf16.mxu1 %v2273_v58  ;;  %v2305_v5 = vpack.c.bf16 %v1966_v4, %v1965_v3  ;;  %v1968_v7 = vld [vmem:[%s2767_s3 + $0x58] sm:$0xff]  ;;  %v1981_v9 = vld [vmem:[%s2767_s3 + $0x60] sm:$0xff]  ;;  %v1982_v10 = vld [vmem:[%s2767_s3 + $0x68] sm:$0xff] }
  0x11   :  { %2276 = vmatpush3.bf16.msra.mxu1 %v2273_v58  ;;  %v2309_v8 = vpack.c.bf16 %v1968_v7, %v1967_v6  ;;  %v2321_v12 = vpack.c.bf16 %v1982_v10, %v1981_v9  ;;  %v1983_v13 = vld [vmem:[%s2767_s3 + $0x70] sm:$0xff]  ;;  %v1984_v14 = vld [vmem:[%s2767_s3 + $0x78] sm:$0xff]  ;;  %v1989_v16 = vld [vmem:[%s2770_s6] ss:$0 sm:$0xff] }
  0x12   :  { %2304 = vmatpush3.bf16.msra.mxu0 %v2301_v19  ;;  %2278 = vmatprep.subr.bf16.mxu1 %v2277_v60  ;;  %v2325_v15 = vpack.c.bf16 %v1984_v14, %v1983_v13 }
  0x13   :  { %2314 = vmatprep.subr.bf16.mxu0 %v2313_v22 }
  0x15   :  { %2156 = vmatmul.mubr.msk.f32.vlgmr.msra.gmra.mrb[2].mxu0 %vm46_vm0, %v2499_v18  ;;  %2280 = vmatpush3.bf16.msra.mxu1 %v2277_v60 }
  0x16   :  { %2316 = vmatpush3.bf16.msra.mxu0 %v2313_v22  ;;  %2177 = vmatprep.mubr.msk.f32.mxu0 %vm46_vm0, %v2478_v11 }
  0x17   :  { %2318 = vmatprep.subr.bf16.mxu0 %v2317_v25  ;;  %2290 = vmatprep.subr.bf16.mxu1 %v2289_v63 }
  0x18   :  { %2123 = vmatmul.mubr.msk.f32.vlgmr.msra.gmra.mrb[2].mxu1 %vm46_vm0, %v2499_v18 }
  0x19   :  { %2292 = vmatpush3.bf16.msra.mxu1 %v2289_v63  ;;  %2144 = vmatprep.mubr.msk.f32.mxu1 %vm46_vm0, %v2478_v11 }
  0x1a   :  { %2320 = vmatpush3.bf16.msra.mxu0 %v2317_v25  ;;  %2294 = vmatprep.subr.bf16.mxu1 %v2293_v2 }
  0x1b   :  { %2191 = vmatprep.subr.mxu0 %v750_v26 }
  0x1d   :  { %2178 = vmatmul.mubr.msk.f32.vlgmr.msra.gmra.mrb[4].mxu0 %vm46_vm0, %v2499_v18  ;;  %2296 = vmatpush3.bf16.msra.mxu1 %v2293_v2 }
  0x1e   :  { %2192 = vmatpush3.msra.mxu0 %v750_v26  ;;  %2306 = vmatprep.subr.bf16.mxu1 %v2305_v5 }
  0x20   :  { %2145 = vmatmul.mubr.msk.f32.vlgmr.msra.gmra.mrb[4].mxu1 %vm46_vm0, %v2499_v18 }
  0x21   :  { %2308 = vmatpush3.bf16.msra.mxu1 %v2305_v5  ;;  %2166 = vmatprep.mubr.msk.f32.mxu1 %vm46_vm0, %v2478_v11 }
  0x22   :  { %2310 = vmatprep.subr.bf16.mxu1 %v2309_v8 }
  0x25   :  { %2312 = vmatpush3.bf16.msra.mxu1 %v2309_v8 }
  0x26   :  { %2322 = vmatprep.subr.bf16.mxu1 %v2321_v12 }
  0x28   :  { %2167 = vmatmul.mubr.msk.f32.vlgmr.msra.gmra.mrb[6].mxu1 %vm46_vm0, %v2499_v18 }
  0x29   :  { %2324 = vmatpush3.bf16.msra.mxu1 %v2321_v12  ;;  %2188 = vmatprep.mubr.msk.f32.mxu1 %vm46_vm0, %v2478_v11 }
  0x2a   :  { %2326 = vmatprep.subr.bf16.mxu1 %v2325_v15 }
  0x2d   :  { %2328 = vmatpush3.bf16.msra.mxu1 %v2325_v15 }
  0x30   :  { %2189 = vmatmul.mubr.msk.f32.vlgmr.msra.gmra.mrb[8].mxu1 %vm46_vm0, %v2499_v18 }
  0xdf   :  { %v2113_v28 = vpop.f32.mrb[0].mxu1 }
  0xe0   :  { %v125_v30 = vadd.f32 %v2113_v28, %v1935_v27  ;;  %v119_v31 = vpop.f32.mrb[1].mxu1  ;;  %v2135_v32 = vpop.f32.mrb[0].mxu0 }
  0xe1   :  { %v120_v33 = vadd.f32 %v1935_v27, %v119_v31  ;;  %v295_v34 = vpop.f32.mrb[1].mxu0  ;;  %v301_v35 = vadd.f32 %v2135_v32, %v1946_v29 }
  0xe2   :  { %v296_v36 = vadd.f32 %v1946_v29, %v295_v34  ;;  %v129_v38 = vmax.f32 %v125_v30, 0.0 }
  0xe3   :  { %v128_v37 = vmax.f32 %v120_v33, 0.0  ;;  %v305_v40 = vmax.f32 %v301_v35, 0.0 }
  0xe4   :  { %v304_v39 = vmax.f32 %v296_v36, 0.0 }
  0xe5   :  { %2193 = vmatprep.mubr.msk.f32.mxu0 %vm758_vm1, %v128_v37 }
  0xe6   :  { %2194 = vmatmul.mubr.msk.f32.vlgmr.msra.gmra.mrb[6].mxu0 %vm758_vm1, %v129_v38 }
  0xe7   :  { %2196 = vmatprep.mubr.msk.f32.mxu0 %vm758_vm1, %v304_v39 }
  0xe8   :  { %v2157_v42 = vpop.f32.mrb[2].mxu0 }
  0xe9   :  { %v479_v43 = vadd.f32 %v2157_v42, %v1962_v41  ;;  %v473_v44 = vpop.f32.mrb[3].mxu0 }
  0xea   :  { %v474_v45 = vadd.f32 %v1962_v41, %v473_v44  ;;  %2197 = vmatmul.mubr.msk.f32.gmra.mrb[8].mxu0 %vm758_vm1, %v305_v40 }
  0xeb   :  { %v483_v46 = vmax.f32 %v479_v43, 0.0 }
  0xec   :  { %v482_v47 = vmax.f32 %v474_v45, 0.0 }
  0xee   :  { %2199 = vmatprep.mubr.msk.f32.mxu0 %vm758_vm1, %v482_v47  ;;  %v888_v47 = vlaneseq }
  0xef   :  { %2200 = vmatmul.mubr.msk.f32.gmra.mrb[10].mxu0 %vm758_vm1, %v483_v46 }
  0xf0   :  { %v2179_v49 = vpop.f32.mrb[4].mxu0 }
  0xf1   :  { %v657_v50 = vadd.f32 %v2179_v49, %v1978_v48  ;;  %v651_v51 = vpop.f32.mrb[5].mxu0 }
  0xf2   :  { %v652_v52 = vadd.f32 %v1978_v48, %v651_v51 }
  0xf3   :  { %v661_v53 = vmax.f32 %v657_v50, 0.0 }
  0xf4   :  { %v660_v54 = vmax.f32 %v652_v52, 0.0 }
  0xf6   :  { %2202 = vmatprep.mubr.msk.f32.mxu0 %vm758_vm1, %v660_v54  ;;  %v891_v54 = vand.u32 127, %v888_v47 }
  0xf7   :  { %2203 = vmatmul.mubr.msk.f32.gmra.mrb[12].mxu0 %vm758_vm1, %v661_v53  ;;  %v889_v53 = vshrl.u32 %v888_v47, 7 }
  0xf9   :  { %vm2623_vm2 = vcmp.le.s32.totalorder %v891_v54, %v889_v53 }
 0x1b9   :  { %v2195_v17 = vpop.f32.mrb[6].mxu0 }
 0x1ba   :  { %v849_v19 = vpop.f32.mrb[7].mxu0  ;;  %v855_v21 = vadd.f32 %v2195_v17, %v1989_v16 }
 0x1bb   :  { %v850_v20 = vadd.f32 %v1989_v16, %v849_v19 }
 0x1bc   :  { %v896_v27 = vsel %vm758_vm1, %v855_v21, -inf }
 0x1bd   :  { %v2198_v22 = vpop.f32.mrb[8].mxu0  ;;  %v893_v23 = vsel %vm758_vm1, %v850_v20, -inf }
 0x1be   :  { %v859_v24 = vpop.f32.mrb[9].mxu0  ;;  %894 = vmax.xlane.f32.xlu0 %v893_v23  ;;  %v865_v11 = vadd.f32 %v2198_v22, %v1989_v16 }
 0x1bf   :  { %v860_v25 = vadd.f32 %v1989_v16, %v859_v24 }
 0x1c0   :  { %v902_v31 = vsel %vm758_vm1, %v865_v11, -inf }
 0x1c1   :  { %v899_v26 = vsel %vm758_vm1, %v860_v25, -inf }
 0x1c2   :  { %v2201_v18 = vpop.f32.mrb[10].mxu0  ;;  %900 = vmax.xlane.f32.xlu1 %v899_v26  ;;  %897 = vmax.xlane.f32.xlu0 %v896_v27 }
 0x1c3   :  { %v875_v28 = vadd.f32 %v2201_v18, %v1989_v16  ;;  %v869_v29 = vpop.f32.mrb[11].mxu0 }
 0x1c4   :  { %v870_v30 = vadd.f32 %v1989_v16, %v869_v29  ;;  %v1938_v29 = vld [vmem:[%s2768_s4] ss:$0 sm:$0xff] }
 0x1c5   :  { %v908_v33 = vsel %vm758_vm1, %v875_v28, -inf }
 0x1c6   :  { %903 = vmax.xlane.f32.xlu1 %v902_v31  ;;  %v905_v32 = vsel %vm758_vm1, %v870_v30, -inf }
 0x1c7   :  { %906 = vmax.xlane.f32.xlu0 %v905_v32 }
 0x1ca   :  { %v2204_v34 = vpop.f32.mrb[12].mxu0  ;;  %909 = vmax.xlane.f32.xlu1 %v908_v33  ;;  %v2396_v33 = vmov 0.0  }
 0x1cb   :  { %v885_v35 = vadd.f32 %v2204_v34, %v1989_v16  ;;  %v879_v36 = vpop.f32.mrb[13].mxu0  ;;  %2205 = vmatprep.subr.mxu1 %v2396_v33  ;;  %2225 = vmatprep.subr.mxu0 %v2396_v33 }
 0x1cc   :  { %v880_v37 = vadd.f32 %v1989_v16, %v879_v36  ;;  %2207 = vmatprep.mubr.msk.f32.mxu1 %vm2397_vm3, %v2396_v33  ;;  %2227 = vmatprep.mubr.msk.f32.mxu0 %vm2397_vm3, %v2396_v33 }
 0x1cd   :  { %v914_v38 = vsel %vm758_vm1, %v885_v35, -inf }
 0x1ce   :  { %915 = vmax.xlane.f32.xlu1 %v914_v38  ;;  %v911_v39 = vsel %vm758_vm1, %v880_v37, -inf }
 0x1cf   :  { %912 = vmax.xlane.f32.xlu0 %v911_v39 }
 0x24b   :  { %v895_v40 = vpop.xlane.xlu0 %894 }
 0x24c   :  { %v917_v41 = vsub.f32 %v850_v20, %v895_v40 }
 0x24e   :  { %v925_v42 = vmul.f32 1.442695, %v917_v41 }
 0x24f   :  { %v901_v43 = vpop.xlane.xlu1 %900  ;;  %v898_v44 = vpop.xlane.xlu0 %897 }
 0x250   :  { %2340 = vpow2.f32 %v925_v42  ;;  %v919_v45 = vsub.f32 %v860_v25, %v901_v43  ;;  %v918_v46 = vsub.f32 %v855_v21, %v898_v44 }
 0x252   :  { %v929_v48 = vmul.f32 1.442695, %v919_v45  ;;  %v927_v49 = vmul.f32 1.442695, %v918_v46 }
 0x253   :  { %v904_v50 = vpop.xlane.xlu1 %903 }
 0x254   :  { %2342 = vpow2.f32 %v929_v48  ;;  %v920_v51 = vsub.f32 %v865_v11, %v904_v50  ;;  %v907_v52 = vpop.xlane.xlu0 %906 }
 0x255   :  { %2344 = vpow2.f32 %v927_v49  ;;  %v921_v55 = vsub.f32 %v870_v30, %v907_v52 }
 0x256   :  { %v931_v56 = vmul.f32 1.442695, %v920_v51  ;;  %v1954_v51 = vld [vmem:[%s2768_s4 + $0x1] ss:$0 sm:$0xff] }
 0x257   :  { %v933_v57 = vmul.f32 1.442695, %v921_v55  ;;  %v910_v58 = vpop.xlane.xlu1 %909 }
 0x258   :  { %2346 = vpow2.f32 %v931_v56  ;;  %v922_v59 = vsub.f32 %v875_v28, %v910_v58  ;;  %v2124_v28 = vpop.f32.mrb[2].mxu1  ;;  %v1986_v58 = vld [vmem:[%s2768_s4 + $0x3] ss:$0 sm:$0xff] }
 0x259   :  { %2348 = vpow2.f32 %v933_v57  ;;  %v207_v30 = vpop.f32.mrb[3].mxu1  ;;  %v213_v31 = vadd.f32 %v2124_v28, %v1938_v29 }
 0x25a   :  { %v2341_v61 = vpop.eup %2340  ;;  %v935_v62 = vmul.f32 1.442695, %v922_v59  ;;  %v208_v32 = vadd.f32 %v1938_v29, %v207_v30  ;;  %v2146_v34 = vpop.f32.mrb[4].mxu1  ;;  %v2017_v29 = vld [vmem:[%s2772_s8] ss:$0 sm:$0xff] }
 0x25b   :  { %v916_v63 = vpop.xlane.xlu1 %915  ;;  %v2629_v0 = vsel %vm2623_vm2, %v2341_v61, 0.0 }
 0x25c   :  { %2350 = vpow2.f32 %v935_v62  ;;  %v924_v1 = vsub.f32 %v885_v35, %v916_v63  ;;  %v913_v2 = vpop.xlane.xlu0 %912  ;;  %v949_v3 = vsel %vm758_vm1, %v2629_v0, 0.0  ;;  %2206 = vmatpush3.msra.mxu1 %v208_v32  ;;  %v385_v35 = vpop.f32.mrb[5].mxu1  ;;  %v391_v63 = vadd.f32 %v2146_v34, %v1954_v51 }
 0x25d   :  { %v923_v4 = vsub.f32 %v880_v37, %v913_v2  ;;  %950 = vadd.xlane.f32.xlu0 %v949_v3  ;;  %2210 = vmatprep.subr.mxu1 %v2396_v33  ;;  %v2168_v36 = vpop.f32.mrb[6].mxu1  ;;  %v1970_v37 = vld [vmem:[%s2768_s4 + $0x2] ss:$0 sm:$0xff]  ;;  %v386_v53 = vadd.f32 %v1954_v51, %v385_v35 }
 0x25e   :  { %v2343_v5 = vpop.eup %2342  ;;  %v939_v6 = vmul.f32 1.442695, %v924_v1  ;;  %v563_v38 = vpop.f32.mrb[7].mxu1  ;;  %v569_v42 = vadd.f32 %v2168_v36, %v1970_v37 }
 0x25f   :  { %v2345_v7 = vpop.eup %2344  ;;  %v937_v8 = vmul.f32 1.442695, %v923_v4  ;;  %v2635_v9 = vsel %vm2623_vm2, %v2343_v5, 0.0  ;;  %v564_v39 = vadd.f32 %v1970_v37, %v563_v38  ;;  %v2190_v40 = vpop.f32.mrb[8].mxu1 }
 0x260   :  { %2352 = vpow2.f32 %v939_v6  ;;  %v955_v10 = vsel %vm758_vm1, %v2635_v9, 0.0  ;;  %v2641_v12 = vsel %vm2623_vm2, %v2345_v7, 0.0  ;;  %v741_v41 = vpop.f32.mrb[9].mxu1  ;;  %v747_v3 = vadd.f32 %v2190_v40, %v1986_v58 }
 0x261   :  { %2354 = vpow2.f32 %v937_v8  ;;  %956 = vadd.xlane.f32.xlu0 %v955_v10  ;;  %v952_v13 = vsel %vm758_vm1, %v2641_v12, 0.0  ;;  %2226 = vmatpush3.msra.mxu0 %v564_v39  ;;  %v1573_v10 = vld [vmem:[%s2771_s7] sm:$0xff] }
 0x262   :  { %v2347_v14 = vpop.eup %2346  ;;  %953 = vadd.xlane.f32.xlu1 %v952_v13  ;;  %2235 = vmatprep.subr.mxu0 %v2396_v33 }
 0x263   :  { %v2349_v15 = vpop.eup %2348  ;;  %v2647_v16 = vsel %vm2623_vm2, %v2347_v14, 0.0 }
 0x264   :  { %v958_v17 = vsel %vm758_vm1, %v2647_v16, 0.0  ;;  %v2653_v19 = vsel %vm2623_vm2, %v2349_v15, 0.0 }
 0x265   :  { %v961_v20 = vsel %vm758_vm1, %v2653_v19, 0.0 }
 0x266   :  { %v2351_v21 = vpop.eup %2350  ;;  %959 = vadd.xlane.f32.xlu1 %v958_v17  ;;  %962 = vadd.xlane.f32.xlu0 %v961_v20 }
 0x267   :  { %v2659_v22 = vsel %vm2623_vm2, %v2351_v21, 0.0 }
 0x268   :  { %v964_v23 = vsel %vm758_vm1, %v2659_v22, 0.0 }
 0x26a   :  { %v2353_v24 = vpop.eup %2352  ;;  %965 = vadd.xlane.f32.xlu1 %v964_v23 }
 0x26b   :  { %v2355_v25 = vpop.eup %2354  ;;  %v2665_v11 = vsel %vm2623_vm2, %v2353_v24, 0.0 }
 0x26c   :  { %v970_v26 = vsel %vm758_vm1, %v2665_v11, 0.0  ;;  %v2671_v27 = vsel %vm2623_vm2, %v2355_v25, 0.0 }
 0x26d   :  { %v967_v18 = vsel %vm758_vm1, %v2671_v27, 0.0 }
 0x26e   :  { %971 = vadd.xlane.f32.xlu1 %v970_v26  ;;  %968 = vadd.xlane.f32.xlu0 %v967_v18  ;;  %v2014_v18 = vld [vmem:[%s2771_s7 + $0x18] sm:$0xff] }
 0x2ea   :  { %v951_v43 = vpop.xlane.xlu0 %950 }
 0x2eb   :  { %2356 = vrcp.f32 %v951_v43 }
 0x2ee   :  { %v957_v44 = vpop.xlane.xlu0 %956 }
 0x2ef   :  { %v954_v45 = vpop.xlane.xlu1 %953 }
 0x2f0   :  { %2358 = vrcp.f32 %v954_v45 }
 0x2f1   :  { %2360 = vrcp.f32 %v957_v44 }
 0x2f3   :  { %v960_v46 = vpop.xlane.xlu1 %959  ;;  %v963_v47 = vpop.xlane.xlu0 %962 }
 0x2f4   :  { %2362 = vrcp.f32 %v963_v47 }
 0x2f5   :  { %v2357_v48 = vpop.eup %2356  ;;  %2364 = vrcp.f32 %v960_v46 }
 0x2f6   :  { %v981_v49 = vmul.f32 %v2357_v48, %v2629_v0  ;;  %v742_v0 = vadd.f32 %v1986_v58, %v741_v41 }
 0x2f7   :  { %v966_v50 = vpop.xlane.xlu1 %965 }
 0x2f8   :  { %2208 = vmatmul.mubr.msk.f32.vlgmr.msra.gmra.mrb[10].mxu1 %vm758_vm1, %v981_v49  ;;  %2366 = vrcp.f32 %v966_v50 }
 0x2f9   :  { %2211 = vmatpush3.msra.mxu1 %v213_v31  ;;  %2212 = vmatprep.mubr.msk.f32.mxu1 %vm2397_vm3, %v2396_v33 }
 0x2fa   :  { %v2359_v52 = vpop.eup %2358  ;;  %2215 = vmatprep.subr.mxu1 %v2396_v33 }
 0x2fb   :  { %v982_v54 = vmul.f32 %v2359_v52, %v2641_v12  ;;  %v972_v55 = vpop.xlane.xlu1 %971  ;;  %v969_v56 = vpop.xlane.xlu0 %968 }
 0x2fc   :  { %v2361_v57 = vpop.eup %2360  ;;  %2368 = vrcp.f32 %v969_v56 }
 0x2fd   :  { %2213 = vmatmul.mubr.msk.f32.vlgmr.msra.gmra.mrb[12].mxu1 %vm758_vm1, %v982_v54  ;;  %2370 = vrcp.f32 %v972_v55  ;;  %v983_v60 = vmul.f32 %v2361_v57, %v2635_v9  ;;  %v2006_v9 = vld [vmem:[%s2771_s7 + $0x8] sm:$0xff] }
 0x2fe   :  { %2216 = vmatpush3.msra.mxu1 %v386_v53  ;;  %2217 = vmatprep.mubr.msk.f32.mxu1 %vm2397_vm3, %v2396_v33  ;;  %v2363_v59 = vpop.eup %2362 }
 0x2ff   :  { %2220 = vmatprep.subr.mxu1 %v2396_v33  ;;  %v2365_v61 = vpop.eup %2364  ;;  %v985_v62 = vmul.f32 %v2363_v59, %v2653_v19 }
 0x300   :  { %v984_v1 = vmul.f32 %v2365_v61, %v2647_v16 }
 0x301   :  { %2218 = vmatmul.mubr.msk.f32.vlgmr.msra.gmra.mrb[14].mxu1 %vm758_vm1, %v983_v60  ;;  %2228 = vmatmul.mubr.msk.f32.vlgmr.msra.gmra.mrb[14].mxu0 %vm758_vm1, %v985_v62 }
 0x302   :  { %2221 = vmatpush3.msra.mxu1 %v391_v63  ;;  %2222 = vmatprep.mubr.msk.f32.mxu1 %vm2397_vm3, %v2396_v33  ;;  %v2367_v2 = vpop.eup %2366 }
 0x303   :  { %2230 = vmatprep.subr.mxu1 %v2396_v33  ;;  %2236 = vmatpush3.msra.mxu0 %v742_v0  ;;  %v986_v5 = vmul.f32 %v2367_v2, %v2659_v22  ;;  %v2011_v22 = vld [vmem:[%s2771_s7 + $0x10] sm:$0xff]  ;;  %s1924_s7 = sshll.u32 %s2398_s30, 4  ;;  %s1925_s7 = int_to_ptr.vmem [resolvable:$true] %s1924_s7 }
 0x304   :  { %2237 = vmatprep.mubr.msk.f32.mxu0 %vm2397_vm3, %v2396_v33  ;;  %2245 = vmatprep.subr.mxu0 %v2006_v9  ;;  %s2372_s10 = scalar_lea.vmem %s1925_s7, 256  ;;  %p2377_p1 = scmp.lt.s32.totalorder %s1925_s7, %s1925_s7 }
 0x305   :  { %2223 = vmatmul.mubr.msk.f32.vlgmr.msra.gmra.mrb[16].mxu1 %vm758_vm1, %v984_v1  ;;  %p2373_p0 = scmp.ne.s32.totalorder %s1925_s7, %s2372_s10  ;;  %p2378_p2 = scmp.lt.s32.totalorder %s2372_s10, %s2372_s10 }
 0x306   :  { %2231 = vmatpush3.msra.mxu1 %v569_v42  ;;  %2232 = vmatprep.mubr.msk.f32.mxu1 %vm2397_vm3, %v2396_v33  ;;  %v2369_v4 = vpop.eup %2368 }
 0x307   :  { %2240 = vmatprep.subr.mxu1 %v2396_v33  ;;  %v2371_v6 = vpop.eup %2370  ;;  %v987_v7 = vmul.f32 %v2369_v4, %v2671_v27  ;;  %p2379_p3 = por %p2378_p2, %p2377_p1 }
 0x308   :  { %v988_v8 = vmul.f32 %v2371_v6, %v2665_v11 }
 0x309   :  { %2233 = vmatmul.mubr.msk.f32.vlgmr.msra.gmra.mrb[18].mxu1 %vm758_vm1, %v986_v5  ;;  %2238 = vmatmul.mubr.msk.f32.vlgmr.msra.gmra.mrb[16].mxu0 %vm758_vm1, %v987_v7  ;;  %p2380_p4 = pnand %p2379_p3, %p2373_p0 }
 0x30a   :  { %2241 = vmatpush3.msra.mxu1 %v747_v3  ;;  %2242 = vmatprep.mubr.msk.f32.mxu1 %vm2397_vm3, %v2396_v33 }
 0x30b   :  { %2246 = vmatpush3.msra.mxu0 %v2006_v9 }
 0x30c   :  { %2250 = vmatprep.subr.mxu0 %v1573_v10 }
 0x30d   :  { %2243 = vmatmul.mubr.msk.f32.vlgmr.msra.gmra.mrb[20].mxu1 %vm758_vm1, %v988_v8 }
 0x3cb   :  { %v1058_v12 = vpop.f32.mrb[10].mxu1 }
 0x3cc   :  { %v2209_v13 = vpop.f32.mrb[11].mxu1 }
 0x3d0   :  { %v1131_v14 = vpop.f32.mrb[12].mxu1 }
 0x3d1   :  { %v2214_v15 = vpop.f32.mrb[13].mxu1 }
 0x3d4   :  { %v1204_v16 = vpop.f32.mrb[14].mxu1  ;;  %v1350_v17 = vpop.f32.mrb[14].mxu0 }
 0x3d5   :  { %v2219_v19 = vpop.f32.mrb[15].mxu1  ;;  %2247 = vmatprep.mubr.msk.f32.mxu0 %vm758_vm1, %v1204_v16  ;;  %v2229_v20 = vpop.f32.mrb[15].mxu0 }
 0x3d8   :  { %v1277_v21 = vpop.f32.mrb[16].mxu1 }
 0x3d9   :  { %v2224_v23 = vpop.f32.mrb[17].mxu1  ;;  %2248 = vmatmul.mubr.msk.f32.vlgmr.msra.gmra.mrb[18].mxu0 %vm758_vm1, %v1277_v21 }
 0x3da   :  { %2251 = vmatpush3.msra.mxu0 %v1573_v10  ;;  %2252 = vmatprep.mubr.msk.f32.mxu0 %vm758_vm1, %v1058_v12 }
 0x3db   :  { %2255 = vmatprep.subr.mxu0 %v2011_v22 }
 0x3dc   :  { %v1423_v24 = vpop.f32.mrb[18].mxu1  ;;  %v1496_v25 = vpop.f32.mrb[16].mxu0 }
 0x3dd   :  { %v2234_v11 = vpop.f32.mrb[19].mxu1  ;;  %v2239_v26 = vpop.f32.mrb[17].mxu0 }
 0x3e0   :  { %v1569_v27 = vpop.f32.mrb[20].mxu1 }
 0x3e1   :  { %v2244_v28 = vpop.f32.mrb[21].mxu1  ;;  %2253 = vmatmul.mubr.msk.f32.vlgmr.msra.gmra.mrb[18].mxu0 %vm758_vm1, %v1131_v14 }
 0x3e2   :  { %2256 = vmatpush3.msra.mxu0 %v2011_v22  ;;  %2257 = vmatprep.mubr.msk.f32.mxu0 %vm758_vm1, %v1350_v17 }
 0x3e3   :  { %2260 = vmatprep.subr.mxu0 %v2014_v18 }
 0x3e9   :  { %2258 = vmatmul.mubr.msk.f32.vlgmr.msra.gmra.mrb[18].mxu0 %vm758_vm1, %v1423_v24 }
 0x3ea   :  { %2261 = vmatpush3.msra.mxu0 %v2014_v18  ;;  %2262 = vmatprep.mubr.msk.f32.mxu0 %vm758_vm1, %v1496_v25 }
 0x3f1   :  { %2263 = vmatmul.mubr.msk.f32.vlgmr.msra.gmra.mrb[18].mxu0 %vm758_vm1, %v1569_v27 }
 0x4c4   :  { %v2264_v30 = vpop.f32.mrb[18].mxu0 }
 0x4c5   :  { %v1916_v31 = vadd.f32 %v2264_v30, %v2017_v29  ;;  %v1897_v32 = vpop.f32.mrb[19].mxu0 }
 0x4c6   :  { %v1915_v33 = vadd.f32 %v2017_v29, %v1897_v32 }
 0x4c7   :  { %1918 = vst.msk [vmem:[#allocation2 + $0x8] sm:$0xff] %vm46_vm0, %v1916_v31 }
 0x4c8   :  { %1917 = vst.msk [vmem:[#allocation2] sm:$0xff] %vm46_vm0, %v1915_v33 }
 0x4c9   :  { %2383 = shalt.err (!%p2380_p4)
}
 0x4ca   :  { %s2384_s12 = scalar_lea.hbm %s2773_s9, 256 }
 0x4cb   :  { %p2385_p5 = scmp.ne.s32.totalorder %s2773_s9, %s2384_s12  ;;  %p2388_p6 = scmp.lt.u32.totalorder %s2384_s12, %s2773_s9 }
 0x4cd   :  { %p2390_p7 = pnand %p2388_p6, %p2385_p5 }
 0x4cf   :  { %2393 = shalt.err (!%p2390_p7)
}
 0x4d0   :  { %s2399_s16 = smov 128   ;;  %s2400_s17 = smov 8  }
 0x4d1   :  { %1930 = dma.vmem_to_hbm [thread:$0]  %s1925_s7, 256, %s2773_s9, [#allocation3], %s2399_s16, %s2399_s16, %s2400_s17  }
 0x4d2   :  { %2394 = dma.done.wait [#allocation3], 256  }
 0x4d3   :  { %2395 = vsyncadd [#allocation3], 4294967040 }
 0x4d4   :  { %1934 = vsyncpa [#allocation3], 1 }

</bundles_post_ra>
